<compile_context>
chip_gen: v7x
topology: tpu7x:2x2x1
jax: 0.10.0
libtpu: 0.0.40
codegen_flags: <defaults>
</compile_context>

<pallas_src>
import functools

import jax
import jax.numpy as jnp
from jax.experimental import pallas as pl
from jax.experimental.pallas import tpu as pltpu


# MXU operand dtype (accumulation is always float32 via preferred_element_type).
# bf16 is the native MXU operand dtype on v5e/v6e/v7x and halves weight VMEM/DMA.
MATMUL_DTYPE = jnp.bfloat16


def _layernorm(x, gamma, beta, eps=1e-5):
    """PyTorch nn.LayerNorm: biased variance, eps inside sqrt (two-pass stats)."""
    mu = jnp.mean(x, axis=-1, keepdims=True)
    xc = x - mu
    var = jnp.mean(xc * xc, axis=-1, keepdims=True)
    return xc * jax.lax.rsqrt(var + eps) * gamma + beta


# -----------------------------------------------------------------------------
# Fused transformer stack kernel:
#   for each layer: LN1 -> MHA -> +res -> LN2 -> FF(exact GELU) -> +res
# Residual stream lives in a VMEM scratch across the layer grid axis.
# -----------------------------------------------------------------------------
def _vit_stack_kernel(
    x_ref,                          # (Bs, Np, D)  f32 input tokens (read at layer 0)
    g1_ref, b1_ref,                 # (1, 1, D)    LayerNorm1
    wqkv_ref,                       # (1, D, 3*inner)  bf16 fused QKV weight
    wo_ref, bo_ref,                 # (1, inner, D) bf16, (1, 1, D)
    g2_ref, b2_ref,                 # (1, 1, D)    LayerNorm2
    w1_ref, bb1_ref,                # (1, D, mlp) bf16, (1, 1, mlp)
    w2_ref, bb2_ref,                # (1, mlp, D) bf16, (1, 1, D)
    o_ref,                          # (Bs, Np, D)
    acc_ref,                        # (Bs, Np, D)  f32 residual-stream scratch
    *, heads, dim_head, n_real, matmul_dtype,
):
    f32 = jnp.float32
    md = lambda t: t.astype(matmul_dtype)
    layer = pl.program_id(1)

    # Load the input tokens into the resident f32 accumulator on the first layer.
    @pl.when(layer == 0)
    def _():
        acc_ref[...] = x_ref[...].astype(f32)

    bs, n_tok, d_model = acc_ref.shape
    inner = heads * dim_head
    rows = bs * n_tok
    scale = dim_head ** -0.5

    # Fold batch into the matmul row dimension (Np is a sublane multiple).
    x = acc_ref[...].reshape(rows, d_model)

    # Hoist the small (1, D)/(1, mlp) params once.
    g1, b1 = g1_ref[0], b1_ref[0]
    g2, b2 = g2_ref[0], b2_ref[0]
    bo, bb1, bb2 = bo_ref[0], bb1_ref[0], bb2_ref[0]

    # ---- LayerNorm 1 + multi-head attention ---------------------------------
    xn = _layernorm(x, g1, b1)
    # ONE fused, lane-dense QKV matmul: (rows, D) @ (D, 3*inner).
    qkv = jnp.dot(md(xn), wqkv_ref[0], preferred_element_type=f32)   # (rows, 3*inner)
    q = qkv[:, :inner] * scale          # fold 1/sqrt(dh) into q
    k = qkv[:, inner:2 * inner]
    v = qkv[:, 2 * inner:]

    # Additive mask for padded key columns (built once, static n_real).
    if n_tok > n_real:
        col = jax.lax.broadcasted_iota(jnp.int32, (1, n_tok, n_tok), 2)
        key_bias = jnp.where(col < n_real, 0.0, -1e30).astype(f32)   # (1, Np, Np)
    else:
        key_bias = None

    # Scores / softmax / context per head (these matmuls are inherently per
    # head); slices are at static 32-lane offsets, reshapes stay tile-aligned.
    ctx_heads = []
    for h in range(heads):
        sl = slice(h * dim_head, (h + 1) * dim_head)
        qh = q[:, sl].reshape(bs, n_tok, dim_head)
        kh = k[:, sl].reshape(bs, n_tok, dim_head)
        vh = v[:, sl].reshape(bs, n_tok, dim_head)
        s = jnp.einsum("bnd,bmd->bnm", md(qh), md(kh),
                       preferred_element_type=f32)                    # (Bs, Np, Np)
        if key_bias is not None:
            s = s + key_bias
        s = s - jnp.max(s, axis=-1, keepdims=True)
        p = jnp.exp(s)
        attn = p * pl.reciprocal(jnp.sum(p, axis=-1, keepdims=True), approx=True)
        ch = jnp.einsum("bnm,bmd->bnd", md(attn), md(vh),
                        preferred_element_type=f32)                   # (Bs, Np, dh)
        ctx_heads.append(ch.reshape(rows, dim_head))

    # Single K = inner output projection on the lane-concatenated head contexts.
    ctx = jnp.concatenate(ctx_heads, axis=-1)                         # (rows, inner)
    attn_out = jnp.dot(md(ctx), wo_ref[0], preferred_element_type=f32)
    x1 = x + attn_out + bo                                            # residual 1

    # ---- LayerNorm 2 + FeedForward (Linear -> exact GELU -> Linear) ---------
    xn2 = _layernorm(x1, g2, b2)
    hmid = jnp.dot(md(xn2), w1_ref[0], preferred_element_type=f32) + bb1
    hmid = jax.nn.gelu(hmid, approximate=False)      # PyTorch default (erf) GELU
    ff = jnp.dot(md(hmid), w2_ref[0], preferred_element_type=f32) + bb2
    y = x1 + ff                                                       # residual 2

    acc_ref[...] = y.reshape(bs, n_tok, d_model)

    # Write the output block only once, after the last layer (block index is
    # constant across the layer axis, so HBM writeback happens after this).
    @pl.when(layer == pl.num_programs(1) - 1)
    def _():
        o_ref[...] = acc_ref[...].astype(o_ref.dtype)


def _pick_batch_block(batch, n_tok, target_rows=256):
    """Largest batch chunk whose folded row count stays MXU-friendly while
    keeping >= 2 parallel grid steps (megacore / v7x) when batch >= 2."""
    best = 1
    for cand in range(1, batch + 1):
        if batch % cand:
            continue
        if cand * n_tok > target_rows:
            continue
        if batch // cand < 2 and batch > 1:
            continue
        best = cand
    return best


def transformer_stack(x, layers, *, heads, dim_head, n_real):
    """Run ALL transformer blocks in one pallas_call (encoder + decoder)."""
    B, n_tok, D = x.shape
    num_layers = len(layers)
    f32 = jnp.float32

    # Stack per-layer params with a leading layer axis; big weights -> bf16.
    st = lambda name, dt: jnp.stack([lp[name].astype(dt) for lp in layers], axis=0)
    weights = (
        st("g1", f32), st("b1", f32),
        st("wqkv", MATMUL_DTYPE),
        st("wo", MATMUL_DTYPE), st("bo", f32),
        st("g2", f32), st("b2", f32),
        st("w1", MATMUL_DTYPE), st("bb1", f32),
        st("w2", MATMUL_DTYPE), st("bb2", f32),
    )

    b_sub = _pick_batch_block(B, n_tok)
    grid = (B // b_sub, num_layers)

    x_spec = pl.BlockSpec((b_sub, n_tok, D), lambda b, l: (b, 0, 0))
    w_spec = lambda a: pl.BlockSpec((1,) + a.shape[1:], lambda b, l: (l, 0, 0))

    # Explicit VMEM budget: double-buffered x/out blocks and per-layer weights
    # plus the resident scratch + headroom, clamped to v7x's 64 MiB physical VMEM.
    block_bytes = b_sub * n_tok * D * 4
    per_layer_w_bytes = sum(int(a.size) * a.dtype.itemsize for a in weights) // num_layers
    vmem_limit = 2 * (2 * block_bytes + per_layer_w_bytes) + block_bytes + (16 << 20)
    vmem_limit = int(min(max(vmem_limit, 32 << 20), 64 << 20))

    kernel = functools.partial(
        _vit_stack_kernel, heads=heads, dim_head=dim_head,
        n_real=n_real, matmul_dtype=MATMUL_DTYPE)

    return pl.pallas_call(
        kernel,
        out_shape=jax.ShapeDtypeStruct((B, n_tok, D), x.dtype),
        grid=grid,
        in_specs=[x_spec] + [w_spec(a) for a in weights],
        out_specs=pl.BlockSpec((b_sub, n_tok, D), lambda b, l: (b, 0, 0)),
        scratch_shapes=[pltpu.VMEM((b_sub, n_tok, D), jnp.float32)],
        compiler_params=pltpu.CompilerParams(
            dimension_semantics=("parallel", "arbitrary"),
            vmem_limit_bytes=vmem_limit),
    )(x, *weights)


# -----------------------------------------------------------------------------
# PatchEmbedding kernel: linear patch projection + CLS prepend + pos-embedding,
# with the token dim zero-padded to a sublane multiple; one full-slab store.
# -----------------------------------------------------------------------------
def _patch_embed_kernel(p_ref, w_ref, b_ref, cls_ref, pos_ref, o_ref, *, n_pad):
    f32 = jnp.float32
    patches = p_ref[0].astype(MATMUL_DTYPE)                             # (P, PD)
    emb = jnp.dot(patches, w_ref[...], preferred_element_type=f32) + b_ref[...]
    cls = cls_ref[...].astype(f32)                                      # (1, D)
    tok = jnp.concatenate([cls, emb], axis=0) + pos_ref[...]            # (n_real, D)
    if n_pad:
        tok = jnp.concatenate(
            [tok, jnp.zeros((n_pad, tok.shape[1]), f32)], axis=0)       # (Np, D)
    o_ref[0] = tok.astype(o_ref.dtype)                                  # single store


def patch_embed(patches, pe, *, n_pad_tokens):
    B, P, PD = patches.shape
    D = pe["w"].shape[1]
    n_tok = P + 1 + n_pad_tokens
    w_mm = pe["w"].astype(MATMUL_DTYPE)

    kernel = functools.partial(_patch_embed_kernel, n_pad=n_pad_tokens)
    return pl.pallas_call(
        kernel,
        out_shape=jax.ShapeDtypeStruct((B, n_tok, D), jnp.float32),
        grid=(B,),
        in_specs=[
            pl.BlockSpec((1, P, PD), lambda b: (b, 0, 0)),
            pl.BlockSpec(w_mm.shape, lambda b: (0, 0)),
            pl.BlockSpec(pe["b"].shape, lambda b: (0, 0)),
            pl.BlockSpec(pe["cls"].shape, lambda b: (0, 0)),
            pl.BlockSpec(pe["pos"].shape, lambda b: (0, 0)),
        ],
        out_specs=pl.BlockSpec((1, n_tok, D), lambda b: (b, 0, 0)),
        compiler_params=pltpu.CompilerParams(dimension_semantics=("parallel",)),
    )(patches, w_mm, pe["b"], pe["cls"], pe["pos"])


# -----------------------------------------------------------------------------
# Decoder output head: Linear(dim, output_dim) on the CLS token
# -----------------------------------------------------------------------------
def _linear_kernel(x_ref, w_ref, b_ref, o_ref):
    y = jnp.dot(x_ref[...].astype(MATMUL_DTYPE), w_ref[...],
                preferred_element_type=jnp.float32) + b_ref[...]
    o_ref[...] = y.astype(o_ref.dtype)


def linear_head(x, w, b):
    B = x.shape[0]
    out_dim = w.shape[1]
    return pl.pallas_call(
        _linear_kernel,
        out_shape=jax.ShapeDtypeStruct((B, out_dim), x.dtype),
    )(x, w.astype(MATMUL_DTYPE), b)


# -----------------------------------------------------------------------------
# Full ViT forward
# -----------------------------------------------------------------------------
def _to_patches(img, patch_size):
    """einops Rearrange('b c (h p1) (w p2) -> b (h w) (p1 p2 c)') as reshapes."""
    B, C, H, W = img.shape
    p = patch_size
    x = img.reshape(B, C, H // p, p, W // p, p)
    x = x.transpose(0, 2, 4, 3, 5, 1)               # b, h, w, p1, p2, c
    return x.reshape(B, (H // p) * (W // p), p * p * C)


def vit_forward(img, params, *, patch_size, heads, dim_head):
    patches = _to_patches(img, patch_size)
    n_real = params["patch"]["pos"].shape[0]
    n_pad_tokens = (-n_real) % 8                     # pad tokens to sublane multiple
    x = patch_embed(patches, params["patch"], n_pad_tokens=n_pad_tokens)
    layers = list(params["encoder"]) + list(params["decoder"]["layers"])
    x = transformer_stack(x, layers, heads=heads, dim_head=dim_head, n_real=n_real)
    cls = x[:, 0]                                    # CLS token is row 0 (real)
    return linear_head(cls, params["decoder"]["head_w"], params["decoder"]["head_b"])


# -----------------------------------------------------------------------------
# Pure-JAX reference (mirrors the PyTorch forward) and parameter init
# -----------------------------------------------------------------------------
def _block_reference(x, p, *, heads, dim_head):
    B, N, D = x.shape
    inner = heads * dim_head

    def ln(v, g, b):
        mu = jnp.mean(v, axis=-1, keepdims=True)
        var = jnp.mean((v - mu) ** 2, axis=-1, keepdims=True)
        return (v - mu) / jnp.sqrt(var + 1e-5) * g + b

    xn = ln(x, p["g1"], p["b1"])
    qkv = xn @ p["wqkv"]
    q, k, v = jnp.split(qkv, 3, axis=-1)
    rh = lambda t: t.reshape(B, N, heads, dim_head).transpose(0, 2, 1, 3)
    q, k, v = rh(q), rh(k), rh(v)
    dots = jnp.einsum("bhnd,bhmd->bhnm", q, k) * dim_head ** -0.5
    attn = jax.nn.softmax(dots, axis=-1)
    ctx = jnp.einsum("bhnm,bhmd->bhnd", attn, v)
    ctx = ctx.transpose(0, 2, 1, 3).reshape(B, N, inner)
    x1 = x + ctx @ p["wo"] + p["bo"]
    xn2 = ln(x1, p["g2"], p["b2"])
    h = jax.nn.gelu(xn2 @ p["w1"] + p["bb1"], approximate=False)
    return x1 + h @ p["w2"] + p["bb2"]


def vit_reference(img, params, *, patch_size, heads, dim_head):
    B = img.shape[0]
    pe = params["patch"]
    patches = _to_patches(img, patch_size)
    x = patches @ pe["w"] + pe["b"]
    cls = jnp.broadcast_to(pe["cls"][None], (B, 1, pe["cls"].shape[-1]))
    x = jnp.concatenate([cls, x], axis=1) + pe["pos"][None]
    for lp in params["encoder"]:
        x = _block_reference(x, lp, heads=heads, dim_head=dim_head)
    for lp in params["decoder"]["layers"]:
        x = _block_reference(x, lp, heads=heads, dim_head=dim_head)
    return x[:, 0] @ params["decoder"]["head_w"] + params["decoder"]["head_b"]


def init_vit_params(key, *, image_size, patch_size, channels, dim, depth,
                    decoder_depth, heads, dim_head, mlp_dim, output_dim):
    inner = heads * dim_head
    patch_dim = channels * patch_size ** 2
    n_tokens = (image_size // patch_size) ** 2 + 1
    keys = iter(jax.random.split(key, 128))

    def nrm(shape, scale=0.05):
        return scale * jax.random.normal(next(keys), shape, jnp.float32)

    def block_params():
        return dict(
            g1=jnp.ones((1, dim), jnp.float32), b1=jnp.zeros((1, dim), jnp.float32),
            wqkv=nrm((dim, 3 * inner)),
            wo=nrm((inner, dim)), bo=nrm((1, dim), 0.01),
            g2=jnp.ones((1, dim), jnp.float32), b2=jnp.zeros((1, dim), jnp.float32),
            w1=nrm((dim, mlp_dim)), bb1=nrm((1, mlp_dim), 0.01),
            w2=nrm((mlp_dim, dim)), bb2=nrm((1, dim), 0.01),
        )

    return dict(
        patch=dict(w=nrm((patch_dim, dim)), b=nrm((1, dim), 0.01),
                   cls=nrm((1, dim), 1.0), pos=nrm((n_tokens, dim), 0.02)),
        encoder=[block_params() for _ in range(depth)],
        decoder=dict(layers=[block_params() for _ in range(decoder_depth)],
                     head_w=nrm((dim, output_dim)), head_b=nrm((1, output_dim), 0.01)),
    )


if __name__ == "__main__":
    # Small ViT config.  dim / inner / mlp are multiples of 128 so every matmul
    # operand and output slab is lane-dense; tokens are padded to 24 sublanes.
    image_size, patch_size, channels = 16, 4, 3
    dim, heads, dim_head, mlp_dim = 128, 4, 32, 256
    depth, decoder_depth, output_dim = 2, 1, 10
    B = 2

    key = jax.random.PRNGKey(0)
    pkey, xkey = jax.random.split(key)
    params = init_vit_params(
        pkey, image_size=image_size, patch_size=patch_size, channels=channels,
        dim=dim, depth=depth, decoder_depth=decoder_depth, heads=heads,
        dim_head=dim_head, mlp_dim=mlp_dim, output_dim=output_dim)

    img = jax.random.normal(xkey, (B, channels, image_size, image_size), jnp.float32)

    out = vit_forward(img, params, patch_size=patch_size,
                      heads=heads, dim_head=dim_head)
    out = jax.block_until_ready(out)

    ref = vit_reference(img, params, patch_size=patch_size,
                        heads=heads, dim_head=dim_head)
    assert out.shape == (B, output_dim)
    # Tolerance accounts for bf16 MXU operands (f32 accumulation) and the
    # approximate (EUP) softmax reciprocal, vs. the full-f32 reference.
    assert jnp.allclose(out, ref, atol=8e-2, rtol=8e-2), (
        "kernel/reference mismatch: max abs err = "
        f"{float(jnp.max(jnp.abs(out - ref)))}")

    print("KERNEL_OK")
</pallas_src>

<mosaic_0001>
module attributes {stable_mosaic.version = 11 : i64} {
  func.func @_patch_embed_kernel(%arg0: i32, %arg1: memref<1x16x48xf32, #tpu.memory_space<vmem>>, %arg2: memref<48x128xbf16, #tpu.memory_space<vmem>>, %arg3: memref<1x128xf32, #tpu.memory_space<vmem>>, %arg4: memref<1x128xf32, #tpu.memory_space<vmem>>, %arg5: memref<17x128xf32, #tpu.memory_space<vmem>>, %arg6: memref<1x24x128xf32, #tpu.memory_space<vmem>>) attributes {dimension_semantics = [#tpu.dimension_semantics<parallel>], iteration_bounds = array<i64: 2>, scalar_prefetch = 0 : i64, scratch_operands = 0 : i64, tpu.core_type = #tpu.core_type<tc>, window_params = [{transform_indices = @transform_0, window_bounds = array<i64: 1, 16, 48>}, {pipeline_mode = #tpu.pipeline_mode<synchronous>, transform_indices = @transform_1, window_bounds = array<i64: 48, 128>}, {pipeline_mode = #tpu.pipeline_mode<synchronous>, transform_indices = @transform_2, window_bounds = array<i64: 1, 128>}, {pipeline_mode = #tpu.pipeline_mode<synchronous>, transform_indices = @transform_3, window_bounds = array<i64: 1, 128>}, {pipeline_mode = #tpu.pipeline_mode<synchronous>, transform_indices = @transform_4, window_bounds = array<i64: 17, 128>}, {transform_indices = @transform_5, window_bounds = array<i64: 1, 24, 128>}]} {
    %c0 = arith.constant 0 : index
    %c0_0 = arith.constant 0 : index
    %c0_1 = arith.constant 0 : index
    %0 = vector.load %arg1[%c0, %c0_0, %c0_1] : memref<1x16x48xf32, #tpu.memory_space<vmem>>, vector<1x16x48xf32>
    %1 = vector.shape_cast %0 : vector<1x16x48xf32> to vector<16x48xf32>
    %2 = arith.truncf %1 : vector<16x48xf32> to vector<16x48xbf16>
    %c0_2 = arith.constant 0 : index
    %c0_3 = arith.constant 0 : index
    %3 = vector.load %arg2[%c0_2, %c0_3] : memref<48x128xbf16, #tpu.memory_space<vmem>>, vector<48x128xbf16>
    %cst = arith.constant dense<0.000000e+00> : vector<16x128xf32>
    %4 = tpu.matmul %2, %3, %cst {dimension_numbers = #tpu.dot_dimension_numbers<[1], [0], [0], [1], [0, 0, 1, 1], [], []>} : vector<16x48xbf16>, vector<48x128xbf16>, vector<16x128xf32> -> vector<16x128xf32>
    %c0_4 = arith.constant 0 : index
    %c0_5 = arith.constant 0 : index
    %5 = vector.load %arg3[%c0_4, %c0_5] : memref<1x128xf32, #tpu.memory_space<vmem>>, vector<1x128xf32>
    %6 = vector.broadcast %5 : vector<1x128xf32> to vector<16x128xf32>
    %7 = arith.addf %4, %6 : vector<16x128xf32>
    %c0_6 = arith.constant 0 : index
    %c0_7 = arith.constant 0 : index
    %8 = vector.load %arg4[%c0_6, %c0_7] : memref<1x128xf32, #tpu.memory_space<vmem>>, vector<1x128xf32>
    %9 = tpu.concatenate %8, %7 in 0 : vector<1x128xf32>, vector<16x128xf32> -> vector<17x128xf32>
    %c0_8 = arith.constant 0 : index
    %c0_9 = arith.constant 0 : index
    %10 = vector.load %arg5[%c0_8, %c0_9] : memref<17x128xf32, #tpu.memory_space<vmem>>, vector<17x128xf32>
    %11 = arith.addf %9, %10 : vector<17x128xf32>
    %cst_10 = arith.constant 0.000000e+00 : f32
    %12 = vector.broadcast %cst_10 : f32 to vector<7x128xf32>
    %13 = tpu.concatenate %11, %12 in 0 : vector<17x128xf32>, vector<7x128xf32> -> vector<24x128xf32>
    %c0_11 = arith.constant 0 : index
    %c0_12 = arith.constant 0 : index
    %c0_13 = arith.constant 0 : index
    %14 = vector.load %arg6[%c0_11, %c0_12, %c0_13] : memref<1x24x128xf32, #tpu.memory_space<vmem>>, vector<1x24x128xf32>
    %15 = vector.shape_cast %14 : vector<1x24x128xf32> to vector<24x128xf32>
    %16 = vector.shape_cast %13 : vector<24x128xf32> to vector<1x24x128xf32>
    tpu.vector_store %arg6[%c0_11, %c0_12, %c0_13], %16 {strides = array<i32>} : memref<1x24x128xf32, #tpu.memory_space<vmem>>, vector<1x24x128xf32>,
    return
  }
  func.func @transform_0(%arg0: i32) -> (i32, i32, i32) {
    %c0_i32 = arith.constant 0 : i32
    %c0_i32_0 = arith.constant 0 : i32
    %c0_i32_1 = arith.constant 0 : i32
    return %arg0, %c0_i32, %c0_i32_0 : i32, i32, i32
  }
  func.func @transform_1(%arg0: i32) -> (i32, i32) {
    %c0_i32 = arith.constant 0 : i32
    %c0_i32_0 = arith.constant 0 : i32
    %c0_i32_1 = arith.constant 0 : i32
    return %c0_i32, %c0_i32_0 : i32, i32
  }
  func.func @transform_2(%arg0: i32) -> (i32, i32) {
    %c0_i32 = arith.constant 0 : i32
    %c0_i32_0 = arith.constant 0 : i32
    %c0_i32_1 = arith.constant 0 : i32
    return %c0_i32, %c0_i32_0 : i32, i32
  }
  func.func @transform_3(%arg0: i32) -> (i32, i32) {
    %c0_i32 = arith.constant 0 : i32
    %c0_i32_0 = arith.constant 0 : i32
    %c0_i32_1 = arith.constant 0 : i32
    return %c0_i32, %c0_i32_0 : i32, i32
  }
  func.func @transform_4(%arg0: i32) -> (i32, i32) {
    %c0_i32 = arith.constant 0 : i32
    %c0_i32_0 = arith.constant 0 : i32
    %c0_i32_1 = arith.constant 0 : i32
    return %c0_i32, %c0_i32_0 : i32, i32
  }
  func.func @transform_5(%arg0: i32) -> (i32, i32, i32) {
    %c0_i32 = arith.constant 0 : i32
    %c0_i32_0 = arith.constant 0 : i32
    %c0_i32_1 = arith.constant 0 : i32
    return %arg0, %c0_i32, %c0_i32_0 : i32, i32, i32
  }
}

</mosaic_0001>

<bundles_post_ra>
// kernel: tpu_custom_call.1
= control target key start
LH: loop header
LB: loop body
LE: loop exit
PB: predicated region body
PF: predicated region fallthrough
CT: control target
= control target key end

     0   :  { %10 = vsyncpa [#allocation3], 0  ;;  %s1044_s0 = inlined_call_operand.hbm [shape: f32[2,16,48], index: 0, kind: input, shape index: {}]   ;;  %s1045_s1 = inlined_call_operand.hbm [shape: bf16[48,128], index: 1, kind: input, shape index: {}]   ;;  %s1046_s2 = inlined_call_operand.vmem [shape: f32[1,128], index: 2, kind: input, shape index: {}]   ;;  %s1047_s3 = inlined_call_operand.vmem [shape: f32[1,128], index: 3, kind: input, shape index: {}]   ;;  %s1048_s4 = inlined_call_operand.hbm [shape: f32[17,128], index: 4, kind: input, shape index: {}]   ;;  %s1049_s5 = inlined_call_operand.hbm [shape: f32[2,24,128], index: 5, kind: output, shape index: {}]  }
   0x1   :  { %12 = vsyncpa [#allocation3 + $0x1], 0 }
   0x2   :  { %13 = vsyncpa [#allocation6], 0 }
   0x3   :  { %14 = vsyncpa [#allocation4], 0 }
   0x4   :  { %16 = vsyncpa [#allocation4 + $0x1], 0  ;;  %s794_s18 = smov 0   ;;  %s796_s19 = smov 0  }
   0x5   :  { %s798_s20 = smov 0   ;;  %s800_s21 = smov 0  }
   0x6 LB: > { %s815_s22 = sadd.s32 4294967295, %s750_s21   ;;  %s479_s23 = sadd.s32 4294967294, %s750_s21   ;;  %s750_s21 = sphi %s800_s21, %s1069_s21   ;;  %s746_s20 = sphi %s798_s20, %s1068_s20   ;;  %s742_s19 = sphi %s796_s19, %s1067_s19   ;;  %s738_s18 = sphi %s794_s18, %s1066_s18  }
   0x7   : > { %p42_p0 = scmp.ne.s32.totalorder %s742_s19, %s738_s18  ;;  %p1050_p1 = scmp.eq.s32.totalorder %s815_s22, 0 }
   0x8   : > { %p156_p3 = scmp.eq.s32.totalorder %s479_s23, 1  ;;  %p480_p5 = scmp.ge.s32.totalorder %s750_s21, 1 }
   0x9   : > { %p824_p4 = por %p1050_p1, %p42_p0  ;;  %p163_p7 = scmp.lt.s32.totalorder %s750_s21, 3 }
   0xa   : > { %p829_p6 = por %p156_p3, %p42_p0  ;;  %s752_s27 = smov [#allocation5]  }
   0xb   : > { %s1053_s24 = scalar_select %p824_p4, 1, 0 }
   0xc   : > { %s1054_s25 = scalar_select %p829_p6, 1, 0 }
   0xd   : > { %p834_p8 = pnand %p480_p5, %p163_p7  ;;  %s175_s28 = sshll.u32 %s752_s27, 4  ;;  %s838_s28 = int_to_ptr.vmem [resolvable:$true] %s175_s28 }
   0xe   : > { %s753_s30 = smov [#allocation7]   ;;  %s594_s9 = scalar_lea.hbm %s1045_s1, 384 }
   0xf   : > { %p528_p9 = pneg %p834_p8  ;;  %s194_s6 = sshll.u32 %s753_s30, 4  ;;  %s849_s6 = int_to_ptr.vmem [resolvable:$true] %s194_s6 }
  0x10   : > { %p595_p12 = scmp.ne.s32.totalorder %s1045_s1, %s594_s9  ;;  %p601_p5 = scmp.lt.u32.totalorder %s594_s9, %s1045_s1 }
  0x11   : > { %p845_p11 = pnand %p528_p9, %p1050_p1 }
  0x13   : > { %p596_p13 = pneg %p845_p11 }
  0x15   : > { %p597_p0 = pnand %p596_p13, %p595_p12 }
  0x17   : > { %p598_p3 = pneg %p597_p0 }
  0x19   : > { %p603_p7 = pnand %p601_p5, %p598_p3 }
  0x1b   : > { %606 = shalt.err (!%p603_p7)
}
  0x1c   : > { %s607_s14 = scalar_lea.vmem %s838_s28, 384  ;;  %p615_p2 = scmp.lt.s32.totalorder %s838_s28, %s838_s28 }
  0x1d   : > { %p608_p9 = scmp.ne.s32.totalorder %s838_s28, %s607_s14  ;;  %p616_p12 = scmp.lt.s32.totalorder %s607_s14, %s607_s14 }
  0x1f   : > { %p610_p10 = pnand %p608_p9, %p596_p13  ;;  %p617_p0 = por %p616_p12, %p615_p2 }
  0x21   : > { %p611_p1 = pneg %p610_p10 }
  0x23   : > { %p618_p6 = pnand %p617_p0, %p611_p1 }
  0x25   : > { %621 = shalt.err (!%p618_p6)
}
  0x26   : > { %s754_s15 = smov 64   ;;  %s755_s16 = smov 4  }
  0x27   : > { %531 = dma.hbm_to_vmem [thread:$0]  (!%p845_p11), %s1045_s1, 384, %s838_s28, [#allocation6], %s754_s15, %s754_s15, %s755_s16  }
  0x28   : > { %s622_s7 = scalar_lea.hbm %s1048_s4, 384 }
  0x29   : > { %p623_p2 = scmp.ne.s32.totalorder %s1048_s4, %s622_s7  ;;  %p629_p10 = scmp.lt.u32.totalorder %s622_s7, %s1048_s4 }
  0x2b   : > { %p625_p1 = pnand %p623_p2, %p596_p13 }
  0x2d   : > { %p626_p6 = pneg %p625_p1 }
  0x2f   : > { %p631_p3 = pnand %p629_p10, %p626_p6 }
  0x31   : > { %634 = shalt.err (!%p631_p3)
}
  0x32   : > { %s635_s28 = scalar_lea.vmem %s849_s6, 384  ;;  %p643_p12 = scmp.lt.s32.totalorder %s849_s6, %s849_s6 }
  0x33   : > { %p636_p5 = scmp.ne.s32.totalorder %s849_s6, %s635_s28  ;;  %p644_p0 = scmp.lt.s32.totalorder %s635_s28, %s635_s28 }
  0x35   : > { %p638_p7 = pnand %p636_p5, %p596_p13  ;;  %p645_p2 = por %p644_p0, %p643_p12 }
  0x37   : > { %p639_p9 = pneg %p638_p7 }
  0x39   : > { %p646_p1 = pnand %p645_p2, %p639_p9 }
  0x3b   : > { %649 = shalt.err (!%p646_p1)
}
  0x3c   : > { %s756_s12 = smov 128   ;;  %s757_s13 = smov 8  }
  0x3d   : > { %534 = dma.hbm_to_vmem [thread:$0]  (!%p845_p11), %s1048_s4, 384, %s849_s6, [#allocation6], %s756_s12, %s756_s12, %s757_s13  }
  0x3e   : > { %s907_s16 = sadd.s32 1, %s750_s21   ;;  %s29_s23 = sadd.s32 1, %s746_s20 }
  0x3f   : > { %s26_s17 = ssub.s32 %s750_s21, %s907_s16  ;;  %p36_p6 = scmp.ne.s32.totalorder %s746_s20, %s742_s19 }
  0x40   : > { %p27_p13 = scmp.eq.s32.totalorder %s26_s17, 0  ;;  %p37_p10 = scmp.eq.s32.totalorder %s750_s21, 0 }
  0x41   : > { %p1057_p5 = scmp.eq.s32.totalorder %s815_s22, 1  ;;  %p545_p9 = scmp.lt.s32.totalorder %s750_s21, 2 }
  0x42   : > { %s916_s27 = scalar_select %p27_p13, %s746_s20, %s29_s23  }
  0x43   : > { %p38_p3 = por %p37_p10, %p36_p6  ;;  %p920_p7 = por %p1057_p5, %p36_p6 }
  0x44   : > { %s208_s30 = sand.u32 1, %s746_s20   ;;  %s499_s6 = sshll.u32 %s750_s21, 8 }
  0x45   : > { %s1058_s29 = scalar_select %p920_p7, 1, 0 }
  0x46   : > { %s484_s7 = sshll.u32 %s208_s30, 4  ;;  %s930_s10 = scalar_lea.hbm %s1044_s0, %s499_s6 }
  0x47   : > { %s212_s11 = scalar_lea.vmem [#allocation2], %s484_s7  ;;  %p934_p11 = pnand %p545_p9, %p38_p3 }
  0x48   : > { %s219_s28 = sshll.u32 %s212_s11, 4  ;;  %s938_s15 = scalar_lea.sflag [#allocation3], %s208_s30  ;;  %s932_s28 = int_to_ptr.vmem [resolvable:$true] %s219_s28 }
  0x49   : > { %s650_s17 = scalar_lea.hbm %s930_s10, 256  ;;  %p652_p0 = pneg %p934_p11 }
  0x4a   : > { %p651_p12 = scmp.ne.s32.totalorder %s930_s10, %s650_s17  ;;  %s655_s6 = scalar_lea.hbm %s1044_s0, 512 }
  0x4b   : > { %p656_p13 = scmp.lt.u32.totalorder %s930_s10, %s1044_s0  ;;  %p657_p6 = scmp.lt.u32.totalorder %s655_s6, %s650_s17 }
  0x4c   : > { %p653_p2 = pnand %p652_p0, %p651_p12  ;;  %p659_p3 = scmp.lt.u32.totalorder %s650_s17, %s930_s10 }
  0x4d   : > { %p658_p10 = por %p657_p6, %p656_p13 }
  0x4e   : > { %p654_p1 = pneg %p653_p2 }
  0x4f   : > { %p660_p5 = por %p659_p3, %p658_p10 }
  0x51   : > { %p661_p9 = pnand %p660_p5, %p654_p1 }
  0x53   : > { %664 = shalt.err (!%p661_p9)
}
  0x54   : > { %s665_s30 = scalar_lea.vmem %s932_s28, 256  ;;  %s758_s11 = smov [#allocation2]  }
  0x55   : > { %p666_p12 = scmp.ne.s32.totalorder %s932_s28, %s665_s30  ;;  %s670_s23 = sshll.u32 %s758_s11, 4  ;;  %s671_s23 = int_to_ptr.vmem [resolvable:$false] %s670_s23 }
  0x56   : > { %s672_s7 = scalar_lea.vmem %s671_s23, 512  ;;  %p673_p4 = scmp.lt.s32.totalorder %s932_s28, %s671_s23 }
  0x57   : > { %p668_p2 = pnand %p666_p12, %p652_p0  ;;  %p674_p13 = scmp.lt.s32.totalorder %s672_s7, %s665_s30 }
  0x59   : > { %p669_p7 = pneg %p668_p2  ;;  %p675_p6 = por %p674_p13, %p673_p4 }
  0x5b   : > { %p676_p10 = pnand %p675_p6, %p669_p7 }
  0x5d   : > { %679 = shalt.err (!%p676_p10)
}
  0x5e   : > { %538 = dma.hbm_to_vmem [thread:$0]  (!%p934_p11), %s930_s10, 256, %s932_s28, %s938_s15, %s756_s12, %s756_s12, %s757_s13  }
  0x5f   : > { %231 = sbr.rel (%p834_p8) target bundleno = 355 (0x163), region = 40  ;;  %s972_s17 = sand.u32 (!%p834_p8), 1, %s742_s19  }
  0x60   : > { %s488_s6 = sshll.u32 (!%p834_p8), %s972_s17, 4  ;;  %s234_s8 = scalar_lea.sflag (!%p834_p8), [#allocation3], %s972_s17 }
  0x61   : > { %s237_s9 = scalar_lea.vmem (!%p834_p8), [#allocation2], %s488_s6  ;;  %p1060_p4 = scmp.ne.s32.totalorder (!%p834_p8), %s1053_s24, 0 }
  0x66   : > { %725 = dma.done.wait (%p1060_p4), %s234_s8, 256  }
  0x67   : > { %727 = vsyncadd (%p1060_p4), %s234_s8, 4294967040  ;;  %p1061_p7 = scmp.eq.s32.totalorder %s815_s22, 0 }
  0x69   : > { %729 = dma.done.wait (%p1061_p7), [#allocation6], 768   ;;  %p1062_p11 = pmov %p1061_p7 }
  0x6a   : > { %v759_v0 = vmov 0.0   ;;  %vm760_vm0 = vmmov 0   ;;  %v591_v1 = vld [vmem:[#allocation5] sm:$0xff]   ;;  %v592_v2 = vld [vmem:[#allocation5 + $0x8] sm:$0xff]   ;;  %v593_v3 = vld [vmem:[#allocation5 + $0x10] sm:$0xff]   ;;  %vm307_vm1 = vcmask 392192  }
  0x6b   : > { %731 = vsyncadd (%p1062_p11), [#allocation6], 4294966528  ;;  %504 = vmatprep.subr.bf16.mxu0 %v759_v0  ;;  %510 = vmatprep.mubr.msk.bf16.mxu0 %vm760_vm0, %v759_v0  ;;  %v273_v4 = vld [vmem:[%s237_s9] sm:$0xff]  ;;  %v274_v5 = vld [vmem:[%s237_s9 + $0x8] sm:$0xff]  ;;  %s514_s24 = smul.u32 24, %s972_s17  ;;  %vm355_vm2 = vcmask 1040384  }
  0x6c   : > { %505 = vmatpush3.bf16.msra.mxu0 %v591_v1  ;;  %v275_v6 = vpack.c.bf16 %v274_v5, %v273_v4  ;;  %v491_v7 = vld [vmem:[%s1046_s2] ss:$0 sm:$0xff]  ;;  %v363_v14 = vld [vmem:[#allocation7] sm:$0xff]  ;;  %s515_s15 = smul.u32 384, %s815_s22  ;;  %v365_v17 = vld [vmem:[#allocation7 + $0x10] sm:$0x1] }
  0x6d   : > { %506 = vmatprep.subr.bf16.mxu0 %v759_v0  ;;  %v352_v11 = vld [vmem:[%s1047_s3] sm:$0x1]  ;;  %s271_s28 = scalar_lea.vmem [#allocation8], %s514_s24  ;;  %s374_s22 = scalar_lea.sflag [#allocation4], %s972_s17 }
  0x6e   : > { %s387_s14 = sshll.u32 %s271_s28, 4  ;;  %v364_v20 = vld [vmem:[#allocation7 + $0x8] sm:$0xff]  ;;  %s999_s23 = scalar_lea.hbm %s1049_s5, %s515_s15  ;;  %s993_s14 = int_to_ptr.vmem [resolvable:$true] %s387_s14 }
  0x6f   : > { %s680_s7 = scalar_lea.vmem %s993_s14, 384  ;;  %p1063_p0 = scmp.ne.s32.totalorder %s1058_s29, 0 }
  0x70   : > { %507 = vmatpush3.bf16.msra.mxu0 %v592_v2  ;;  %p681_p8 = scmp.ne.s32.totalorder %s993_s14, %s680_s7  ;;  %s761_s6 = smov [#allocation8]  }
  0x71   : > { %508 = vmatprep.subr.bf16.mxu0 %v759_v0  ;;  %s684_s8 = sshll.u32 %s761_s6, 4  ;;  %s685_s8 = int_to_ptr.vmem [resolvable:$false] %s684_s8 }
  0x72   : > { %p682_p1 = pnand %p681_p8, %p1063_p0  ;;  %s686_s9 = scalar_lea.vmem %s685_s8, 768 }
  0x73   : > { %p687_p5 = scmp.lt.s32.totalorder %s993_s14, %s685_s8  ;;  %p688_p9 = scmp.lt.s32.totalorder %s686_s9, %s680_s7 }
  0x74   : > { %509 = vmatpush3.bf16.msra.mxu0 %v593_v3  ;;  %p683_p3 = pneg %p682_p1 }
  0x75   : > { %p689_p12 = por %p688_p9, %p687_p5 }
  0x77   : > { %511 = vmatmul.mubr.msk.bf16.vlgmr.msra.gmra.mrb[0].mxu0 %vm307_vm1, %v275_v6  ;;  %p690_p2 = pnand %p689_p12, %p683_p3 }
 0x14a   : > { %v345_v8 = vpop.f32.mrb[0].mxu0 }
 0x14b   : > { %v346_v9 = vadd.f32 %v491_v7, %v345_v8  ;;  %v512_v10 = vpop.f32.mrb[1].mxu0 }
 0x14c   : > { %v348_v12 = vpop.f32.mrb[2].mxu0 }
 0x14d   : > { %v356_v13 = vrot.slane %v346_v9, 7  ;;  %v349_v15 = vadd.f32 %v491_v7, %v348_v12  ;;  %v513_v16 = vpop.f32.mrb[3].mxu0 }
 0x14f   : > { %v362_v18 = vsel %vm355_vm2, %v352_v11, %v356_v13  ;;  %v357_v19 = vrot.slane %v349_v15, 7 }
 0x150   : > { %v366_v21 = vadd.f32 %v363_v14, %v362_v18 }
 0x151   : > { %v358_v22 = vsel %vm355_vm2, %v356_v13, %v357_v19  ;;  %v368_v23 = vadd.f32 %v365_v17, %v357_v19 }
 0x152   : > { %370 = vst [vmem:[%s271_s28] sm:$0xff] %v366_v21  ;;  %v367_v24 = vadd.f32 %v364_v20, %v358_v22 }
 0x153   : > { %v369_v25 = vsel %vm355_vm2, %v368_v23, 0.0 }
 0x154   : > { %371 = vst [vmem:[%s271_s28 + $0x8] sm:$0xff] %v367_v24  ;;  %372 = vst [vmem:[%s271_s28 + $0x10] sm:$0xff] %v369_v25 }
 0x155   : > { %693 = shalt.err (!%p690_p2)
}
 0x156   : > { %s694_s24 = scalar_lea.hbm %s999_s23, 384  ;;  %s698_s13 = scalar_lea.hbm %s1049_s5, 768 }
 0x157   : > { %p695_p13 = scmp.ne.s32.totalorder %s999_s23, %s694_s24  ;;  %p699_p4 = scmp.lt.u32.totalorder %s999_s23, %s1049_s5 }
 0x158   : > { %p700_p7 = scmp.lt.u32.totalorder %s698_s13, %s694_s24  ;;  %p702_p8 = scmp.lt.u32.totalorder %s694_s24, %s999_s23 }
 0x159   : > { %p696_p6 = pnand %p695_p13, %p1063_p0 }
 0x15a   : > { %p701_p11 = por %p700_p7, %p699_p4 }
 0x15b   : > { %p697_p10 = pneg %p696_p6 }
 0x15c   : > { %p703_p1 = por %p702_p8, %p701_p11 }
 0x15e   : > { %p704_p3 = pnand %p703_p1, %p697_p10 }
 0x160   : > { %707 = shalt.err (!%p704_p3)
}
 0x161   : > { %s762_s15 = smov 128   ;;  %s763_s30 = smov 8  }
 0x162   : > { %526 = dma.vmem_to_hbm [thread:$0]  (%p1063_p0), %s993_s14, 384, %s999_s23, %s374_s22, %s762_s15, %s762_s15, %s763_s30  }
 0x163 PF: > { %s402_s11 = sand.u32 1, %s738_s18   ;;  %p1064_p5 = scmp.ne.s32.totalorder %s1054_s25, 0 }
 0x164   : > { %p1065_p9 = scmp.ge.s32.totalorder %s750_s21, 2  ;;  %s403_s7 = scalar_lea.sflag [#allocation4], %s402_s11 }
 0x166   : > { %p540_p12 = pnand %p1065_p9, %p1064_p5 }
 0x168   : > { %733 = dma.done.wait (!%p540_p12), %s403_s7, 384  }
 0x169   : > { %735 = vsyncadd (!%p540_p12), %s403_s7, 4294966912  ;;  %p19_p2 = scmp.ge.s32.totalorder %s907_s16, 4   ;;  %s1066_s18 = smov %s742_s19 }
 0x16a   : > { %s1067_s19 = smov %s746_s20  ;;  %s1068_s20 = smov %s916_s27 }
 0x16b   : > { %s1069_s21 = smov %s907_s16  ;;  %21 = sbr.rel (!%p19_p2) target bundleno = 6 (0x6), region = 93 }
 0x172   :  { %408 = vsyncpa [#allocation3], 1 }
 0x173   :  { %410 = vsyncpa [#allocation3 + $0x1], 1 }
 0x174   :  { %411 = vsyncpa [#allocation6], 1 }
 0x175   :  { %412 = vsyncpa [#allocation4], 1 }
 0x176   :  { %414 = vsyncpa [#allocation4 + $0x1], 1 }

</bundles_post_ra>
